<compile_context>
chip_gen: v5e
topology: v5e:2x2
jax: 0.10.0
libtpu: 0.0.40
codegen_flags: <defaults>
</compile_context>

<pallas_src>
import functools

import numpy as np

import jax
import jax.numpy as jnp
from jax.experimental import pallas as pl
from jax.experimental.pallas import tpu as pltpu

_LANE = 128   # feature dims padded to multiples of 128 lanes
_TM = 128     # destination-row tile (multiple of 8/16/32; safe on v5e/v6e/v7x)
_TK = 128     # source (contraction) tile for the propagation matmul


def _round_up(x, m):
    return ((x + m - 1) // m) * m


def _pad2(x, rows, cols):
    return jnp.pad(x, ((0, rows - x.shape[0]), (0, cols - x.shape[1])))


def _bf16_split(x):
    """Split f32 x into bf16 (hi, lo) with hi + lo ~= x (residual ~2^-16 |x|)."""
    hi = x.astype(jnp.bfloat16)
    lo = (x - hi.astype(jnp.float32)).astype(jnp.bfloat16)
    return hi, lo


def _split_dot(x_hi, x_lo, w_hi, w_lo):
    """~f32-accurate matmul from bf16 hi/lo operands: 3 single-pass MXU dots."""
    return (jnp.dot(x_hi, w_hi, preferred_element_type=jnp.float32)
            + jnp.dot(x_hi, w_lo, preferred_element_type=jnp.float32)
            + jnp.dot(x_lo, w_hi, preferred_element_type=jnp.float32))


# ------------------------------------------------------------------ kernels

def _mlp_kernel(h_ref, w1hi_ref, w1lo_ref, b1_ref, w2hi_ref, w2lo_ref, b2_ref,
                out_ref):
    """z = relu(h @ W1 + b1) @ W2 + b2 for one tile of node rows (bf16 hi/lo)."""
    h_hi, h_lo = _bf16_split(h_ref[...])
    z1 = _split_dot(h_hi, h_lo, w1hi_ref[...], w1lo_ref[...]) + b1_ref[...]
    z1 = jnp.maximum(z1, 0.0)
    z1_hi, z1_lo = _bf16_split(z1)
    out_ref[...] = (_split_dot(z1_hi, z1_lo, w2hi_ref[...], w2lo_ref[...])
                    + b2_ref[...])


def _prop_kernel(a_ref, fhi_ref, flo_ref, f0_ref, in_norm_ref, out_ref,
                 acc_ref, *, alpha):
    """One APPNP step, contraction(source)-tiled with a VMEM accumulator.

    acc += A_tile @ (out_norm * f)_tile   (A is exact in bf16 -> 2 bf16 passes)
    last source tile:  out = (1-alpha) * in_norm * acc + alpha * f0_tile
    """
    kk = pl.program_id(1)

    @pl.when(kk == 0)
    def _():
        acc_ref[...] = jnp.zeros_like(acc_ref)

    a = a_ref[...].astype(jnp.bfloat16)          # 0/1 int8 -> exact bf16
    acc_ref[...] += (
        jnp.dot(a, fhi_ref[...], preferred_element_type=jnp.float32)
        + jnp.dot(a, flo_ref[...], preferred_element_type=jnp.float32))

    @pl.when(kk == pl.num_programs(1) - 1)
    def _():
        out_ref[...] = ((1.0 - alpha) * (acc_ref[...] * in_norm_ref[...])
                        + alpha * f0_ref[...])


def _readout_kernel(f_ref, wsrc_ref, wdst_ref, logp_ref, esrc_ref, edst_ref, *,
                    valid_cols):
    """Fused masked log_softmax over valid lanes + src/dst attention scores."""
    x = f_ref[...]
    col = jax.lax.broadcasted_iota(jnp.int32, x.shape, 1)
    valid = col < valid_cols
    xm = jnp.where(valid, x, jnp.float32(-1e30))
    m = jnp.max(xm, axis=1, keepdims=True)
    ex = jnp.where(valid, jnp.exp(xm - m), 0.0)
    s = jnp.sum(ex, axis=1, keepdims=True)
    logp_ref[...] = x - (m + jnp.log(s))
    # conv_src / conv_dst (Linear(out_dim -> 1, bias=False)); padded lanes are 0.
    esrc_ref[...] = jnp.sum(x * wsrc_ref[...], axis=1, keepdims=True)
    edst_ref[...] = jnp.sum(x * wdst_ref[...], axis=1, keepdims=True)


def _edge_attn_kernel(a_ref, edst_ref, esrc_ref, out_ref):
    """Per-destination edge softmax of tanh(e_src[u] + e_dst[v]) over incoming edges.

    tanh output is bounded in (-1, 1), so exp cannot overflow: no max trick.
    """
    mask = a_ref[...] > 0                                 # int8 tile -> bool
    scores = jnp.tanh(edst_ref[...] + esrc_ref[...])      # (TM,1)+(1,Np)
    ex = jnp.where(mask, jnp.exp(scores), 0.0)
    denom = jnp.maximum(jnp.sum(ex, axis=1, keepdims=True), jnp.float32(1e-30))
    out_ref[...] = ex / denom                             # exact division


# ------------------------------------------------------------------ wrapper

def appnp_forward(adj, h, w1, b1, w2, b2, w_src, w_dst, *, k=4, alpha=0.1):
    """adj: (N,N) dense 0/1 with adj[dst,src]=1; h: (N,in_dim).

    Returns (log_softmax(features, axis=1) of shape (N,out_dim),
             dense (N,N) edge-softmax attention, zeros at non-edges)."""
    adj = adj.astype(jnp.float32)
    h = h.astype(jnp.float32)
    n, in_dim = h.shape
    hid = w1.shape[1]
    out_dim = w2.shape[1]

    # Pad node count to a multiple of the tiles and feature dims to 128 lanes.
    # Zero-padded nodes have no edges, so they never leak into real rows.
    np_ = max(_round_up(n, max(_TM, _TK)), max(_TM, _TK))
    fi = _round_up(in_dim, _LANE)
    fh = _round_up(hid, _LANE)
    fo = _round_up(out_dim, _LANE)

    adj_p = _pad2(adj, np_, np_)
    h_p = _pad2(h, np_, fi)
    w1_p = _pad2(w1.astype(jnp.float32), fi, fh)
    b1_p = _pad2(b1.reshape(1, -1).astype(jnp.float32), 1, fh)
    w2_p = _pad2(w2.astype(jnp.float32), fh, fo)
    b2_p = _pad2(b2.reshape(1, -1).astype(jnp.float32), 1, fo)
    wsrc_p = _pad2(w_src.reshape(1, -1).astype(jnp.float32), 1, fo)
    wdst_p = _pad2(w_dst.reshape(1, -1).astype(jnp.float32), 1, fo)

    # bf16 hi/lo weight splits (exact-ish f32 via 3 single-pass MXU dots).
    w1_hi, w1_lo = _bf16_split(w1_p)
    w2_hi, w2_lo = _bf16_split(w2_p)

    # Symmetric degree-normalization vectors (kept out of the N x N matrix).
    in_norm = (jnp.maximum(jnp.sum(adj_p, axis=1), 1.0) ** -0.5).reshape(np_, 1)
    out_norm = (jnp.maximum(jnp.sum(adj_p, axis=0), 1.0) ** -0.5).reshape(np_, 1)
    # 0/1 adjacency ships as int8 (exact, half the HBM bytes of bf16's f32
    # predecessor); widened to bf16 in-kernel right before the MXU.
    adj_i8 = adj_p.astype(jnp.int8)

    grid_rows = (np_ // _TM,)
    par_rows = pltpu.CompilerParams(dimension_semantics=("parallel",))

    row_tile = lambda c: pl.BlockSpec((_TM, c), lambda i: (i, 0))
    replicated = lambda r, c: pl.BlockSpec((r, c), lambda i: (0, 0))

    # 1) MLP feature transform (row-tiled; weights replicated per tile).
    # TODO(synk): tile the fi contraction for very large in_dim (Cora-scale).
    z = pl.pallas_call(
        _mlp_kernel,
        out_shape=jax.ShapeDtypeStruct((np_, fo), jnp.float32),
        grid=grid_rows,
        in_specs=[row_tile(fi),
                  replicated(fi, fh), replicated(fi, fh), replicated(1, fh),
                  replicated(fh, fo), replicated(fh, fo), replicated(1, fo)],
        out_specs=row_tile(fo),
        compiler_params=par_rows,
    )(h_p, w1_hi, w1_lo, b1_p, w2_hi, w2_lo, b2_p)

    # 2) K APPNP propagation steps, contraction-tiled over source nodes.
    #    VMEM per step is O(TM*TK + TK*fo), independent of N.
    prop = pl.pallas_call(
        functools.partial(_prop_kernel, alpha=float(alpha)),
        out_shape=jax.ShapeDtypeStruct((np_, fo), jnp.float32),
        grid=(np_ // _TM, np_ // _TK),
        in_specs=[pl.BlockSpec((_TM, _TK), lambda i, kk: (i, kk)),   # A tile (int8)
                  pl.BlockSpec((_TK, fo), lambda i, kk: (kk, 0)),    # (out_norm*f) hi
                  pl.BlockSpec((_TK, fo), lambda i, kk: (kk, 0)),    # (out_norm*f) lo
                  pl.BlockSpec((_TM, fo), lambda i, kk: (i, 0)),     # f0 tile
                  pl.BlockSpec((_TM, 1), lambda i, kk: (i, 0))],     # in-degree norm
        out_specs=pl.BlockSpec((_TM, fo), lambda i, kk: (i, 0)),
        scratch_shapes=[pltpu.VMEM((_TM, fo), jnp.float32)],
        compiler_params=pltpu.CompilerParams(
            dimension_semantics=("parallel", "arbitrary")),
    )
    feat = z
    for _ in range(k):
        # Fold the out-degree norm once per step (cheap N x F elementwise in XLA)
        # and split into bf16 hi/lo (same HBM bytes as one f32 pass).
        f_scaled = feat * out_norm
        f_hi, f_lo = _bf16_split(f_scaled)
        feat = prop(adj_i8, f_hi, f_lo, z, in_norm)

    # 3) log_softmax over the valid lanes + conv_src / conv_dst projections.
    logp, e_src, e_dst = pl.pallas_call(
        functools.partial(_readout_kernel, valid_cols=out_dim),
        out_shape=(jax.ShapeDtypeStruct((np_, fo), jnp.float32),
                   jax.ShapeDtypeStruct((np_, 1), jnp.float32),
                   jax.ShapeDtypeStruct((np_, 1), jnp.float32)),
        grid=grid_rows,
        in_specs=[row_tile(fo), replicated(1, fo), replicated(1, fo)],
        out_specs=(row_tile(fo),
                   pl.BlockSpec((_TM, 1), lambda i: (i, 0)),
                   pl.BlockSpec((_TM, 1), lambda i: (i, 0))),
        compiler_params=par_rows,
    )(feat, wsrc_p, wdst_p)

    # 4) dense edge attention: per-destination softmax over incoming edges.
    e_attn = pl.pallas_call(
        _edge_attn_kernel,
        out_shape=jax.ShapeDtypeStruct((np_, np_), jnp.float32),
        grid=grid_rows,
        in_specs=[row_tile(np_),
                  pl.BlockSpec((_TM, 1), lambda i: (i, 0)),
                  replicated(1, np_)],
        out_specs=row_tile(np_),
        compiler_params=par_rows,
    )(adj_i8, e_dst, e_src.reshape(1, np_))

    return logp[:n, :out_dim], e_attn[:n, :n]


# ---------------------------------------------------------------- reference

def _reference_np(adj, h, w1, b1, w2, b2, w_src, w_dst, k=4, alpha=0.1):
    """Float64 numpy reference of the eval-mode forward pass."""
    adj = np.asarray(adj, np.float64)
    h = np.asarray(h, np.float64)
    w1 = np.asarray(w1, np.float64)
    b1 = np.asarray(b1, np.float64)
    w2 = np.asarray(w2, np.float64)
    b2 = np.asarray(b2, np.float64)
    w_src = np.asarray(w_src, np.float64)
    w_dst = np.asarray(w_dst, np.float64)

    in_norm = np.maximum(adj.sum(axis=1), 1.0) ** -0.5
    out_norm = np.maximum(adj.sum(axis=0), 1.0) ** -0.5
    z = np.maximum(h @ w1 + b1[None, :], 0.0) @ w2 + b2[None, :]
    feat = z
    for _ in range(k):
        feat = ((1.0 - alpha)
                * (in_norm[:, None] * (adj @ (out_norm[:, None] * feat)))
                + alpha * z)
    m = feat.max(axis=1, keepdims=True)
    logp = feat - (m + np.log(np.exp(feat - m).sum(axis=1, keepdims=True)))

    e_src = feat @ w_src                       # (N, 1)
    e_dst = feat @ w_dst                       # (N, 1)
    scores = np.tanh(e_dst + e_src.T)          # scores[v, u]
    mask = adj > 0
    sm = np.where(mask, scores, -1e30)
    mm = np.max(sm, axis=1, keepdims=True)
    ex = np.where(mask, np.exp(sm - mm), 0.0)
    denom = np.maximum(ex.sum(axis=1, keepdims=True), 1e-30)
    return logp, ex / denom


if __name__ == "__main__":
    key = jax.random.PRNGKey(0)
    ks = jax.random.split(key, 7)

    N, in_dim, hidden_dim, out_dim = 16, 8, 32, 8

    # Deterministic random directed graph (~30% density) and features.
    adj = (jax.random.uniform(ks[0], (N, N)) < 0.3).astype(jnp.float32)
    h = jax.random.normal(ks[1], (N, in_dim), dtype=jnp.float32)

    # Deterministic Glorot-ish parameters (shapes from the PyTorch module).
    w1 = jax.random.normal(ks[2], (in_dim, hidden_dim), jnp.float32) * (
        (2.0 / (in_dim + hidden_dim)) ** 0.5)
    b1 = jax.random.normal(ks[3], (hidden_dim,), jnp.float32) * 0.1
    w2 = jax.random.normal(ks[4], (hidden_dim, out_dim), jnp.float32) * (
        (2.0 / (hidden_dim + out_dim)) ** 0.5)
    b2 = jnp.zeros((out_dim,), jnp.float32)
    w_src = jax.random.normal(ks[5], (out_dim, 1), jnp.float32) * (
        (2.0 / (out_dim + 1)) ** 0.5)
    w_dst = jax.random.normal(ks[6], (out_dim, 1), jnp.float32) * (
        (2.0 / (out_dim + 1)) ** 0.5)

    logp, e = appnp_forward(adj, h, w1, b1, w2, b2, w_src, w_dst,
                            k=4, alpha=0.1)
    jax.block_until_ready((logp, e))

    ref_logp, ref_e = _reference_np(adj, h, w1, b1, w2, b2, w_src, w_dst,
                                    k=4, alpha=0.1)

    # Tolerance: the kernel runs ~f32-accurate (bf16 hi/lo split matmuls,
    # residual ~2^-16 relative, accumulated over the MLP + K prop steps) and
    # uses hardware exp/tanh/log; 1e-3 leaves headroom vs the f64 reference.
    logp_np = np.asarray(logp, np.float64)
    e_np = np.asarray(e, np.float64)
    assert np.allclose(logp_np, ref_logp, atol=1e-3, rtol=1e-3), float(
        np.max(np.abs(logp_np - ref_logp)))
    assert np.allclose(e_np, ref_e, atol=1e-3, rtol=1e-3), float(
        np.max(np.abs(e_np - ref_e)))

    print("KERNEL_OK")
</pallas_src>

<mosaic_0001>
module attributes {stable_mosaic.version = 11 : i64} {
  func.func @_mlp_kernel(%arg0: i32, %arg1: memref<128x128xf32, #tpu.memory_space<vmem>>, %arg2: memref<128x128xbf16, #tpu.memory_space<vmem>>, %arg3: memref<128x128xbf16, #tpu.memory_space<vmem>>, %arg4: memref<1x128xf32, #tpu.memory_space<vmem>>, %arg5: memref<128x128xbf16, #tpu.memory_space<vmem>>, %arg6: memref<128x128xbf16, #tpu.memory_space<vmem>>, %arg7: memref<1x128xf32, #tpu.memory_space<vmem>>, %arg8: memref<128x128xf32, #tpu.memory_space<vmem>>) attributes {dimension_semantics = [#tpu.dimension_semantics<parallel>], iteration_bounds = array<i64: 1>, scalar_prefetch = 0 : i64, scratch_operands = 0 : i64, tpu.core_type = #tpu.core_type<tc>, window_params = [{transform_indices = @transform_0, window_bounds = array<i64: 128, 128>}, {pipeline_mode = #tpu.pipeline_mode<synchronous>, transform_indices = @transform_1, window_bounds = array<i64: 128, 128>}, {pipeline_mode = #tpu.pipeline_mode<synchronous>, transform_indices = @transform_2, window_bounds = array<i64: 128, 128>}, {pipeline_mode = #tpu.pipeline_mode<synchronous>, transform_indices = @transform_3, window_bounds = array<i64: 1, 128>}, {pipeline_mode = #tpu.pipeline_mode<synchronous>, transform_indices = @transform_4, window_bounds = array<i64: 128, 128>}, {pipeline_mode = #tpu.pipeline_mode<synchronous>, transform_indices = @transform_5, window_bounds = array<i64: 128, 128>}, {pipeline_mode = #tpu.pipeline_mode<synchronous>, transform_indices = @transform_6, window_bounds = array<i64: 1, 128>}, {transform_indices = @transform_7, window_bounds = array<i64: 128, 128>}]} {
    %c0 = arith.constant 0 : index
    %c0_0 = arith.constant 0 : index
    %0 = vector.load %arg1[%c0, %c0_0] : memref<128x128xf32, #tpu.memory_space<vmem>>, vector<128x128xf32>
    %1 = arith.truncf %0 : vector<128x128xf32> to vector<128x128xbf16>
    %2 = arith.extf %1 : vector<128x128xbf16> to vector<128x128xf32>
    %3 = arith.subf %0, %2 : vector<128x128xf32>
    %4 = arith.truncf %3 : vector<128x128xf32> to vector<128x128xbf16>
    %c0_1 = arith.constant 0 : index
    %c0_2 = arith.constant 0 : index
    %5 = vector.load %arg2[%c0_1, %c0_2] : memref<128x128xbf16, #tpu.memory_space<vmem>>, vector<128x128xbf16>
    %c0_3 = arith.constant 0 : index
    %c0_4 = arith.constant 0 : index
    %6 = vector.load %arg3[%c0_3, %c0_4] : memref<128x128xbf16, #tpu.memory_space<vmem>>, vector<128x128xbf16>
    %cst = arith.constant dense<0.000000e+00> : vector<128x128xf32>
    %7 = tpu.matmul %1, %5, %cst {dimension_numbers = #tpu.dot_dimension_numbers<[1], [0], [0], [1], [0, 0, 1, 1], [], []>} : vector<128x128xbf16>, vector<128x128xbf16>, vector<128x128xf32> -> vector<128x128xf32>
    %cst_5 = arith.constant dense<0.000000e+00> : vector<128x128xf32>
    %8 = tpu.matmul %1, %6, %cst_5 {dimension_numbers = #tpu.dot_dimension_numbers<[1], [0], [0], [1], [0, 0, 1, 1], [], []>} : vector<128x128xbf16>, vector<128x128xbf16>, vector<128x128xf32> -> vector<128x128xf32>
    %9 = arith.addf %7, %8 : vector<128x128xf32>
    %cst_6 = arith.constant dense<0.000000e+00> : vector<128x128xf32>
    %10 = tpu.matmul %4, %5, %cst_6 {dimension_numbers = #tpu.dot_dimension_numbers<[1], [0], [0], [1], [0, 0, 1, 1], [], []>} : vector<128x128xbf16>, vector<128x128xbf16>, vector<128x128xf32> -> vector<128x128xf32>
    %11 = arith.addf %9, %10 : vector<128x128xf32>
    %c0_7 = arith.constant 0 : index
    %c0_8 = arith.constant 0 : index
    %12 = vector.load %arg4[%c0_7, %c0_8] : memref<1x128xf32, #tpu.memory_space<vmem>>, vector<1x128xf32>
    %13 = vector.broadcast %12 : vector<1x128xf32> to vector<128x128xf32>
    %14 = arith.addf %11, %13 : vector<128x128xf32>
    %cst_9 = arith.constant 0.000000e+00 : f32
    %15 = vector.broadcast %cst_9 : f32 to vector<128x128xf32>
    %16 = arith.maximumf %14, %15 : vector<128x128xf32>
    %17 = arith.truncf %16 : vector<128x128xf32> to vector<128x128xbf16>
    %18 = arith.extf %17 : vector<128x128xbf16> to vector<128x128xf32>
    %19 = arith.subf %16, %18 : vector<128x128xf32>
    %20 = arith.truncf %19 : vector<128x128xf32> to vector<128x128xbf16>
    %c0_10 = arith.constant 0 : index
    %c0_11 = arith.constant 0 : index
    %21 = vector.load %arg5[%c0_10, %c0_11] : memref<128x128xbf16, #tpu.memory_space<vmem>>, vector<128x128xbf16>
    %c0_12 = arith.constant 0 : index
    %c0_13 = arith.constant 0 : index
    %22 = vector.load %arg6[%c0_12, %c0_13] : memref<128x128xbf16, #tpu.memory_space<vmem>>, vector<128x128xbf16>
    %cst_14 = arith.constant dense<0.000000e+00> : vector<128x128xf32>
    %23 = tpu.matmul %17, %21, %cst_14 {dimension_numbers = #tpu.dot_dimension_numbers<[1], [0], [0], [1], [0, 0, 1, 1], [], []>} : vector<128x128xbf16>, vector<128x128xbf16>, vector<128x128xf32> -> vector<128x128xf32>
    %cst_15 = arith.constant dense<0.000000e+00> : vector<128x128xf32>
    %24 = tpu.matmul %17, %22, %cst_15 {dimension_numbers = #tpu.dot_dimension_numbers<[1], [0], [0], [1], [0, 0, 1, 1], [], []>} : vector<128x128xbf16>, vector<128x128xbf16>, vector<128x128xf32> -> vector<128x128xf32>
    %25 = arith.addf %23, %24 : vector<128x128xf32>
    %cst_16 = arith.constant dense<0.000000e+00> : vector<128x128xf32>
    %26 = tpu.matmul %20, %21, %cst_16 {dimension_numbers = #tpu.dot_dimension_numbers<[1], [0], [0], [1], [0, 0, 1, 1], [], []>} : vector<128x128xbf16>, vector<128x128xbf16>, vector<128x128xf32> -> vector<128x128xf32>
    %27 = arith.addf %25, %26 : vector<128x128xf32>
    %c0_17 = arith.constant 0 : index
    %c0_18 = arith.constant 0 : index
    %28 = vector.load %arg7[%c0_17, %c0_18] : memref<1x128xf32, #tpu.memory_space<vmem>>, vector<1x128xf32>
    %29 = vector.broadcast %28 : vector<1x128xf32> to vector<128x128xf32>
    %30 = arith.addf %27, %29 : vector<128x128xf32>
    %c0_19 = arith.constant 0 : index
    %c0_20 = arith.constant 0 : index
    %31 = vector.load %arg8[%c0_19, %c0_20] : memref<128x128xf32, #tpu.memory_space<vmem>>, vector<128x128xf32>
    tpu.vector_store %arg8[%c0_19, %c0_20], %30 {strides = array<i32>} : memref<128x128xf32, #tpu.memory_space<vmem>>, vector<128x128xf32>,
    return
  }
  func.func @transform_0(%arg0: i32) -> (i32, i32) {
    %c0_i32 = arith.constant 0 : i32
    %c0_i32_0 = arith.constant 0 : i32
    return %arg0, %c0_i32 : i32, i32
  }
  func.func @transform_1(%arg0: i32) -> (i32, i32) {
    %c0_i32 = arith.constant 0 : i32
    %c0_i32_0 = arith.constant 0 : i32
    %c0_i32_1 = arith.constant 0 : i32
    return %c0_i32, %c0_i32_0 : i32, i32
  }
  func.func @transform_2(%arg0: i32) -> (i32, i32) {
    %c0_i32 = arith.constant 0 : i32
    %c0_i32_0 = arith.constant 0 : i32
    %c0_i32_1 = arith.constant 0 : i32
    return %c0_i32, %c0_i32_0 : i32, i32
  }
  func.func @transform_3(%arg0: i32) -> (i32, i32) {
    %c0_i32 = arith.constant 0 : i32
    %c0_i32_0 = arith.constant 0 : i32
    %c0_i32_1 = arith.constant 0 : i32
    return %c0_i32, %c0_i32_0 : i32, i32
  }
  func.func @transform_4(%arg0: i32) -> (i32, i32) {
    %c0_i32 = arith.constant 0 : i32
    %c0_i32_0 = arith.constant 0 : i32
    %c0_i32_1 = arith.constant 0 : i32
    return %c0_i32, %c0_i32_0 : i32, i32
  }
  func.func @transform_5(%arg0: i32) -> (i32, i32) {
    %c0_i32 = arith.constant 0 : i32
    %c0_i32_0 = arith.constant 0 : i32
    %c0_i32_1 = arith.constant 0 : i32
    return %c0_i32, %c0_i32_0 : i32, i32
  }
  func.func @transform_6(%arg0: i32) -> (i32, i32) {
    %c0_i32 = arith.constant 0 : i32
    %c0_i32_0 = arith.constant 0 : i32
    %c0_i32_1 = arith.constant 0 : i32
    return %c0_i32, %c0_i32_0 : i32, i32
  }
  func.func @transform_7(%arg0: i32) -> (i32, i32) {
    %c0_i32 = arith.constant 0 : i32
    %c0_i32_0 = arith.constant 0 : i32
    return %arg0, %c0_i32 : i32, i32
  }
}

</mosaic_0001>

<bundles_post_ra>
// kernel: tpu_custom_call.1
= control target key start
LH: loop header
LB: loop body
LE: loop exit
PB: predicated region body
PF: predicated region fallthrough
CT: control target
= control target key end

     0   :  { %12 = vsyncpa [#allocation3], 0  ;;  %s1568_s0 = inlined_call_operand.hbm [shape: f32[128,128], index: 0, kind: input, shape index: {}]   ;;  %s1569_s1 = inlined_call_operand.hbm [shape: bf16[128,128], index: 1, kind: input, shape index: {}]   ;;  %s1570_s2 = inlined_call_operand.hbm [shape: bf16[128,128], index: 2, kind: input, shape index: {}]   ;;  %s1571_s3 = inlined_call_operand.vmem [shape: f32[1,128], index: 3, kind: input, shape index: {}]   ;;  %s1572_s4 = inlined_call_operand.hbm [shape: bf16[128,128], index: 4, kind: input, shape index: {}]   ;;  %s1573_s5 = inlined_call_operand.hbm [shape: bf16[128,128], index: 5, kind: input, shape index: {}]   ;;  %s1574_s6 = inlined_call_operand.vmem [shape: f32[1,128], index: 6, kind: input, shape index: {}]   ;;  %s1575_s7 = inlined_call_operand.hbm [shape: f32[128,128], index: 7, kind: output, shape index: {}]  }
   0x1   :  { %13 = vsyncpa [#allocation6], 0 }
   0x2   :  { %14 = vsyncpa [#allocation9], 0  ;;  %s33_s26 = sshll.u32 %s1569_s1, 4  ;;  %s34_s26 = int_to_ptr.hbm [resolvable:$true] %s33_s26 }
   0x3   :  { %15 = vsyncpa [#allocation4], 0  ;;  %s1344_s27 = smov [#allocation5]   ;;  %s61_s8 = sshll.u32 %s1572_s4, 4  ;;  %s62_s8 = int_to_ptr.hbm [resolvable:$true] %s61_s8 }
   0x4   :  { %s35_s28 = sshll.u32 %s1344_s27, 4  ;;  %s1345_s9 = smov 64   ;;  %s36_s28 = int_to_ptr.vmem [resolvable:$true] %s35_s28 }
   0x5   :  { %s1346_s10 = smov 4   ;;  %s1347_s11 = smov [#allocation8]  }
   0x6   :  { %41 = dma.hbm_to_vmem [thread:$0]  %s34_s26, 1024, %s36_s28, [#allocation6], %s1345_s9, %s1345_s9, %s1346_s10  }
   0x7   :  { %s63_s12 = sshll.u32 %s1347_s11, 4  ;;  %s20_s14 = sshll.u32 %s1568_s0, 4  ;;  %s64_s12 = int_to_ptr.vmem [resolvable:$true] %s63_s12  ;;  %s21_s14 = int_to_ptr.hbm [resolvable:$true] %s20_s14 }
   0x8   :  { %69 = dma.hbm_to_vmem [thread:$0]  %s62_s8, 1024, %s64_s12, [#allocation9], %s1345_s9, %s1345_s9, %s1346_s10  }
   0x9   :  { %s1348_s4 = smov [#allocation2]   ;;  %s46_s18 = sshll.u32 %s1570_s2, 4  ;;  %s47_s18 = int_to_ptr.hbm [resolvable:$true] %s46_s18 }
   0xa   :  { %s22_s15 = sshll.u32 %s1348_s4, 4  ;;  %s1349_s19 = smov 128   ;;  %s23_s15 = int_to_ptr.vmem [resolvable:$true] %s22_s15 }
   0xb   :  { %s1350_s20 = smov 8   ;;  %s1351_s0 = smov [#allocation7]  }
   0xc   :  { %28 = dma.hbm_to_vmem [thread:$0]  %s21_s14, 2048, %s23_s15, [#allocation3], %s1349_s19, %s1349_s19, %s1350_s20  }
   0xd   :  { %s48_s21 = sshll.u32 %s1351_s0, 4  ;;  %s74_s24 = sshll.u32 %s1573_s5, 4  ;;  %s49_s21 = int_to_ptr.vmem [resolvable:$true] %s48_s21  ;;  %s75_s24 = int_to_ptr.hbm [resolvable:$true] %s74_s24 }
   0xe   :  { %54 = dma.hbm_to_vmem [thread:$0]  %s47_s18, 1024, %s49_s21, [#allocation6], %s1345_s9, %s1345_s9, %s1346_s10  }
   0xf   :  { %s1352_s2 = smov [#allocation10]  }
  0x10   :  { %s76_s25 = sshll.u32 %s1352_s2, 4  ;;  %s77_s25 = int_to_ptr.vmem [resolvable:$true] %s76_s25 }
  0x11   :  { %82 = dma.hbm_to_vmem [thread:$0]  %s75_s24, 1024, %s77_s25, [#allocation9], %s1345_s9, %s1345_s9, %s1346_s10  }
  0x12   :  { %1336 = dma.done.wait [#allocation3], 2048  }
  0x13   :  { %1337 = vsyncadd [#allocation3], 4294965248 }
  0x14   :  { %1338 = dma.done.wait [#allocation6], 2048  }
  0x15   :  { %1339 = vsyncadd [#allocation6], 4294965248 }
  0x16   :  { %1340 = dma.done.wait [#allocation9], 2048  }
  0x17   :  { %1341 = vsyncadd [#allocation9], 4294965248  ;;  %v1147_v0 = vld [vmem:[#allocation7 + $0x38] sm:$0xff]  ;;  %v1146_v2 = vld [vmem:[#allocation7 + $0x30] sm:$0xff]  ;;  %s989_s8 = sshll.u32 %s1575_s7, 4  ;;  %s990_s8 = int_to_ptr.hbm [resolvable:$true] %s989_s8 }
  0x18   :  { %v1139_v1 = vld [vmem:[#allocation5 + $0x38] sm:$0xff]  ;;  %1164 = vmatpush.bf16.msra.mxu2 %v1147_v0  ;;  %v1138_v3 = vld [vmem:[#allocation5 + $0x30] sm:$0xff]  ;;  %305 = vmatpush.bf16.msra.mxu0 %v1147_v0  ;;  %v1145_v4 = vld [vmem:[#allocation7 + $0x28] sm:$0xff] }
  0x19   :  { %1172 = vmatpush.bf16.msra.mxu3 %v1139_v1  ;;  %402 = vmatpush.bf16.msra.mxu1 %v1139_v1  ;;  %v1137_v5 = vld [vmem:[#allocation5 + $0x28] sm:$0xff]  ;;  %v1144_v6 = vld [vmem:[#allocation7 + $0x20] sm:$0xff]  ;;  %v1143_v8 = vld [vmem:[#allocation7 + $0x18] sm:$0xff] }
  0x1a   :  { %v1136_v7 = vld [vmem:[#allocation5 + $0x20] sm:$0xff]  ;;  %v1135_v9 = vld [vmem:[#allocation5 + $0x18] sm:$0xff]  ;;  %v1142_v10 = vld [vmem:[#allocation7 + $0x10] sm:$0xff] }
  0x1b   :  { %v1134_v11 = vld [vmem:[#allocation5 + $0x10] sm:$0xff]  ;;  %v1424_v12 = vld [vmem:[#allocation2 + $0x40] sm:$0xff]  ;;  %v1426_v13 = vld [vmem:[#allocation2 + $0x48] sm:$0xff] }
  0x1c   :  { %1165 = vmatpush.bf16.msra.mxu2 %v1146_v2  ;;  %306 = vmatpush.bf16.msra.mxu0 %v1146_v2  ;;  %v1430_v14 = vpack.c.bf16 %v1424_v12, %v1424_v12  ;;  %v1434_v15 = vpack.c.bf16 %v1426_v13, %v1426_v13  ;;  %v1141_v16 = vld [vmem:[#allocation7 + $0x8] sm:$0xff]  ;;  %v1140_v20 = vld [vmem:[#allocation7] sm:$0xff]  ;;  %v1438_v23 = vld [vmem:[#allocation2 + $0x50] sm:$0xff] }
  0x1d   :  { %1173 = vmatpush.bf16.msra.mxu3 %v1138_v3  ;;  %403 = vmatpush.bf16.msra.mxu1 %v1138_v3  ;;  %v1133_v17 = vld [vmem:[#allocation5 + $0x8] sm:$0xff]  ;;  %v1132_v21 = vld [vmem:[#allocation5] sm:$0xff]  ;;  %v1440_v24 = vld [vmem:[#allocation2 + $0x58] sm:$0xff]  ;;  %v1444_v25 = vpack.c.bf16 %v1438_v23, %v1438_v23 }
  0x1e   :  { %v233_v18 = vunpack.c.l.b16 %v1430_v14  ;;  %v234_v19 = vunpack.c.l.b16 %v1434_v15  ;;  %v1448_v26 = vpack.c.bf16 %v1440_v24, %v1440_v24  ;;  %v105_v30 = vld [vmem:[#allocation2] sm:$0xff]  ;;  %v106_v31 = vld [vmem:[#allocation2 + $0x8] sm:$0xff]  ;;  %v107_v44 = vld [vmem:[#allocation2 + $0x10] sm:$0xff] }
  0x1f   :  { %v235_v27 = vunpack.c.l.b16 %v1444_v25  ;;  %v1452_v32 = vld [vmem:[#allocation2 + $0x60] sm:$0xff]  ;;  %v1454_v33 = vld [vmem:[#allocation2 + $0x68] sm:$0xff]  ;;  %v121_v34 = vpack.c.bf16 %v105_v30, %v105_v30  ;;  %v122_v35 = vpack.c.bf16 %v106_v31, %v106_v31  ;;  %v108_v45 = vld [vmem:[#allocation2 + $0x18] sm:$0xff]  ;;  %v123_v48 = vpack.c.bf16 %v107_v44, %v107_v44 }
  0x20   :  { %1166 = vmatpush.bf16.msra.mxu2 %v1145_v4  ;;  %307 = vmatpush.bf16.msra.mxu0 %v1145_v4  ;;  %v245_v22 = vpack.c.b16 %v234_v19, %v233_v18  ;;  %v236_v28 = vunpack.c.l.b16 %v1448_v26  ;;  %v1458_v38 = vpack.c.bf16 %v1452_v32, %v1452_v32  ;;  %v1462_v39 = vpack.c.bf16 %v1454_v33, %v1454_v33  ;;  %v1466_v46 = vld [vmem:[#allocation2 + $0x70] sm:$0xff]  ;;  %v1468_v47 = vld [vmem:[#allocation2 + $0x78] sm:$0xff]  ;;  %v109_v58 = vld [vmem:[#allocation2 + $0x20] sm:$0xff] }
  0x21   :  { %1174 = vmatpush.bf16.msra.mxu3 %v1137_v5  ;;  %404 = vmatpush.bf16.msra.mxu1 %v1137_v5  ;;  %v225_v36 = vunpack.c.l.b16 %v121_v34  ;;  %v226_v37 = vunpack.c.l.b16 %v122_v35  ;;  %v124_v49 = vpack.c.bf16 %v108_v45, %v108_v45  ;;  %v227_v50 = vunpack.c.l.b16 %v123_v48  ;;  %v110_v59 = vld [vmem:[#allocation2 + $0x28] sm:$0xff] }
  0x22   :  { %v246_v29 = vpack.c.b16 %v236_v28, %v235_v27  ;;  %v237_v41 = vunpack.c.l.b16 %v1458_v38  ;;  %v238_v42 = vunpack.c.l.b16 %v1462_v39  ;;  %v1472_v52 = vpack.c.bf16 %v1466_v46, %v1466_v46 }
  0x23   :  { %v241_v40 = vpack.c.b16 %v226_v37, %v225_v36  ;;  %v228_v51 = vunpack.c.l.b16 %v124_v49  ;;  %v1476_v53 = vpack.c.bf16 %v1468_v47, %v1468_v47  ;;  %v125_v60 = vpack.c.bf16 %v109_v58, %v109_v58 }
  0x24   :  { %1167 = vmatpush.bf16.msra.mxu2 %v1144_v6  ;;  %308 = vmatpush.bf16.msra.mxu0 %v1144_v6  ;;  %v247_v43 = vpack.c.b16 %v238_v42, %v237_v41  ;;  %v239_v55 = vunpack.c.l.b16 %v1472_v52  ;;  %v126_v61 = vpack.c.bf16 %v110_v59, %v110_v59  ;;  %v137_v0 = vunpack.c.l.bf16 %v121_v34  ;;  %v111_v6 = vld [vmem:[#allocation2 + $0x30] sm:$0xff]  ;;  %v1163_v42 = vld [vmem:[#allocation10 + $0x38] sm:$0xff] }
  0x25   :  { %1175 = vmatpush.bf16.msra.mxu3 %v1136_v7  ;;  %405 = vmatpush.bf16.msra.mxu1 %v1136_v7  ;;  %v242_v54 = vpack.c.b16 %v228_v51, %v227_v50  ;;  %v240_v56 = vunpack.c.l.b16 %v1476_v53  ;;  %v229_v62 = vunpack.c.l.b16 %v125_v60  ;;  %v146_v41 = vunpack.c.l.bf16 %v1434_v15  ;;  %v1154_v15 = vld [vmem:[#allocation8 + $0x30] sm:$0xff] }
  0x26   :  { %v230_v63 = vunpack.c.l.b16 %v126_v61  ;;  %v142_v27 = vunpack.c.l.bf16 %v126_v61  ;;  %v147_v51 = vunpack.c.l.bf16 %v1444_v25  ;;  %v1159_v61 = vld [vmem:[#allocation10 + $0x18] sm:$0xff] }
  0x27   :  { %v248_v57 = vpack.c.b16 %v240_v56, %v239_v55 }
  0x28   :  { %1168 = vmatpush.bf16.msra.mxu2 %v1143_v8  ;;  %309 = vmatpush.bf16.msra.mxu0 %v1143_v8  ;;  %v243_v2 = vpack.c.b16 %v230_v63, %v229_v62  ;;  %v127_v8 = vpack.c.bf16 %v111_v6, %v111_v6 }
  0x29   :  { %1176 = vmatpush.bf16.msra.mxu3 %v1135_v9  ;;  %406 = vmatpush.bf16.msra.mxu1 %v1135_v9 }
  0x2c   :  { %1169 = vmatpush.bf16.msra.mxu2 %v1142_v10  ;;  %310 = vmatpush.bf16.msra.mxu0 %v1142_v10  ;;  %v231_v10 = vunpack.c.l.b16 %v127_v8 }
  0x2d   :  { %1177 = vmatpush.bf16.msra.mxu3 %v1134_v11  ;;  %407 = vmatpush.bf16.msra.mxu1 %v1134_v11 }
  0x30   :  { %1170 = vmatpush.bf16.msra.mxu2 %v1141_v16  ;;  %311 = vmatpush.bf16.msra.mxu0 %v1141_v16  ;;  %v139_v16 = vunpack.c.l.bf16 %v123_v48  ;;  %v1155_v48 = vld [vmem:[#allocation8 + $0x38] sm:$0xff] }
  0x31   :  { %1178 = vmatpush.bf16.msra.mxu3 %v1133_v17  ;;  %408 = vmatpush.bf16.msra.mxu1 %v1133_v17 }
  0x32   :  { %v155_v19 = vsub.f32 %v107_v44, %v139_v16  ;;  %v162_v44 = vsub.f32 %v1426_v13, %v146_v41 }
  0x34   :  { %1171 = vmatpush.bf16.msra.mxu2 %v1140_v20  ;;  %312 = vmatpush.bf16.msra.mxu0 %v1140_v20 }
  0x35   :  { %1179 = vmatpush.bf16.msra.mxu3 %v1132_v21  ;;  %409 = vmatpush.bf16.msra.mxu1 %v1132_v21 }
  0x37   :  { %333 = vmatmul.bf16.vlgmr.msra.gmra.mxu2 %v245_v22  ;;  %313 = vmatmul.bf16.vlgmr.msra.gmra.mxu0 %v241_v40 }
  0x38   :  { %451 = vmatpush.bf16.msrb.mxu2 %v1139_v1  ;;  %430 = vmatmul.bf16.vlgmr.msra.gmra.mxu3 %v245_v22  ;;  %v138_v1 = vunpack.c.l.bf16 %v122_v35  ;;  %v141_v22 = vunpack.c.l.bf16 %v125_v60  ;;  %v1152_v60 = vld [vmem:[#allocation8 + $0x20] sm:$0xff] }
  0x39   :  { %410 = vmatmul.bf16.vlgmr.msra.gmra.mxu1 %v241_v40  ;;  %v145_v40 = vunpack.c.l.bf16 %v1430_v14  ;;  %736 = vmatpush.bf16.msrb.mxu3 %v1163_v42  ;;  %v148_v14 = vunpack.c.l.bf16 %v1448_v26  ;;  %v149_v26 = vunpack.c.l.bf16 %v1458_v38 }
  0x3a   :  { %v154_v4 = vsub.f32 %v106_v31, %v138_v1  ;;  %v157_v28 = vsub.f32 %v109_v58, %v141_v22  ;;  %v143_v31 = vunpack.c.l.bf16 %v127_v8  ;;  %833 = vmatpush.bf16.msrb.mxu0 %v1155_v48  ;;  %882 = vmatpush.bf16.msrb.mxu1 %v1155_v48  ;;  %v1160_v58 = vld [vmem:[#allocation10 + $0x20] sm:$0xff]  ;;  %v1158_v1 = vld [vmem:[#allocation10 + $0x10] sm:$0xff] }
  0x3b   :  { %v164_v13 = vsub.f32 %v1440_v24, %v148_v14 }
  0x3c   :  { %452 = vmatpush.bf16.msrb.mxu2 %v1138_v3  ;;  %v153_v3 = vsub.f32 %v105_v30, %v137_v0  ;;  %v159_v35 = vsub.f32 %v111_v6, %v143_v31  ;;  %v1151_v0 = vld [vmem:[#allocation8 + $0x18] sm:$0xff]  ;;  %v1157_v6 = vld [vmem:[#allocation10 + $0x8] sm:$0xff] }
  0x3e   :  { %834 = vmatpush.bf16.msrb.mxu0 %v1154_v15  ;;  %883 = vmatpush.bf16.msrb.mxu1 %v1154_v15 }
  0x40   :  { %453 = vmatpush.bf16.msrb.mxu2 %v1137_v5  ;;  %v169_v5 = vpack.c.bf16 %v154_v4, %v153_v3  ;;  %v1150_v4 = vld [vmem:[#allocation8 + $0x10] sm:$0xff] }
  0x44   :  { %454 = vmatpush.bf16.msrb.mxu2 %v1136_v7  ;;  %v112_v7 = vld [vmem:[#allocation2 + $0x38] sm:$0xff] }
  0x47   :  { %338 = vmatmul.bf16.gmra.mxu2 %v246_v29  ;;  %318 = vmatmul.bf16.gmra.mxu0 %v242_v54 }
  0x48   :  { %455 = vmatpush.bf16.msrb.mxu2 %v1135_v9  ;;  %435 = vmatmul.bf16.gmra.mxu3 %v246_v29  ;;  %v128_v9 = vpack.c.bf16 %v112_v7, %v112_v7  ;;  %v158_v29 = vsub.f32 %v110_v59, %v142_v27  ;;  %v150_v59 = vunpack.c.l.bf16 %v1462_v39  ;;  %v151_v39 = vunpack.c.l.bf16 %v1472_v52 }
  0x49   :  { %415 = vmatmul.bf16.gmra.mxu1 %v242_v54  ;;  %v1161_v54 = vld [vmem:[#allocation10 + $0x28] sm:$0xff] }
  0x4a   :  { %v171_v30 = vpack.c.bf16 %v158_v29, %v157_v28  ;;  %v144_v34 = vunpack.c.l.bf16 %v128_v9  ;;  %v166_v24 = vsub.f32 %v1454_v33, %v150_v59  ;;  %v167_v3 = vsub.f32 %v1466_v46, %v151_v39  ;;  %v1148_v46 = vld [vmem:[#allocation8] sm:$0xff] }
  0x4c   :  { %456 = vmatpush.bf16.msrb.mxu2 %v1134_v11  ;;  %v232_v11 = vunpack.c.l.b16 %v128_v9  ;;  %v160_v36 = vsub.f32 %v112_v7, %v144_v34  ;;  %v1149_v7 = vld [vmem:[#allocation8 + $0x8] sm:$0xff] }
  0x4e   :  { %v244_v18 = vpack.c.b16 %v232_v11, %v231_v10  ;;  %v172_v37 = vpack.c.bf16 %v160_v36, %v159_v35 }
  0x50   :  { %457 = vmatpush.bf16.msrb.mxu2 %v1133_v17  ;;  %v140_v17 = vunpack.c.l.bf16 %v124_v49  ;;  %v1162_v49 = vld [vmem:[#allocation10 + $0x30] sm:$0xff] }
  0x51   :  { %737 = vmatpush.bf16.msrb.mxu3 %v1162_v49 }
  0x52   :  { %v156_v20 = vsub.f32 %v108_v45, %v140_v17  ;;  %v1515_v17 = vld [vmem:[%s1571_s3] ss:$0 sm:$0xff] }
  0x54   :  { %458 = vmatpush.bf16.msrb.mxu2 %v1132_v21  ;;  %v170_v21 = vpack.c.bf16 %v156_v20, %v155_v19 }
  0x55   :  { %738 = vmatpush.bf16.msrb.mxu3 %v1161_v54 }
  0x57   :  { %343 = vmatmul.bf16.gmra.mxu2 %v247_v43  ;;  %323 = vmatmul.bf16.gmra.mxu0 %v243_v2 }
  0x58   :  { %440 = vmatmul.bf16.gmra.mxu3 %v247_v43  ;;  %v161_v43 = vsub.f32 %v1424_v12, %v145_v40  ;;  %v163_v12 = vsub.f32 %v1438_v23, %v147_v51  ;;  %v165_v23 = vsub.f32 %v1452_v32, %v149_v26 }
  0x59   :  { %420 = vmatmul.bf16.gmra.mxu1 %v243_v2  ;;  %739 = vmatpush.bf16.msrb.mxu3 %v1160_v58  ;;  %v152_v2 = vunpack.c.l.bf16 %v1476_v53  ;;  %v1156_v53 = vld [vmem:[#allocation10] sm:$0xff] }
  0x5a   :  { %v173_v45 = vpack.c.bf16 %v162_v44, %v161_v43  ;;  %v174_v56 = vpack.c.bf16 %v164_v13, %v163_v12  ;;  %v175_v63 = vpack.c.bf16 %v166_v24, %v165_v23 }
  0x5b   :  { %v168_v32 = vsub.f32 %v1468_v47, %v152_v2 }
  0x5d   :  { %740 = vmatpush.bf16.msrb.mxu3 %v1159_v61 }
  0x61   :  { %741 = vmatpush.bf16.msrb.mxu3 %v1158_v1 }
  0x65   :  { %742 = vmatpush.bf16.msrb.mxu3 %v1157_v6 }
  0x67   :  { %348 = vmatmul.bf16.gmra.mxu2 %v248_v57  ;;  %328 = vmatmul.bf16.gmra.mxu0 %v244_v18 }
  0x68   :  { %445 = vmatmul.bf16.gmra.mxu3 %v248_v57  ;;  %v1153_v57 = vld [vmem:[#allocation8 + $0x28] sm:$0xff] }
  0x69   :  { %425 = vmatmul.bf16.gmra.mxu1 %v244_v18  ;;  %835 = vmatpush.bf16.msrb.mxu0 %v1153_v57 }
  0x6a   :  { %884 = vmatpush.bf16.msrb.mxu1 %v1153_v57  ;;  %743 = vmatpush.bf16.msrb.mxu3 %v1156_v53 }
  0x6d   :  { %836 = vmatpush.bf16.msrb.mxu0 %v1152_v60 }
  0x6e   :  { %885 = vmatpush.bf16.msrb.mxu1 %v1152_v60 }
  0x71   :  { %837 = vmatpush.bf16.msrb.mxu0 %v1151_v0 }
  0x72   :  { %886 = vmatpush.bf16.msrb.mxu1 %v1151_v0 }
  0x75   :  { %838 = vmatpush.bf16.msrb.mxu0 %v1150_v4 }
  0x76   :  { %887 = vmatpush.bf16.msrb.mxu1 %v1150_v4 }
  0x77   :  { %459 = vmatmul.bf16.vlgmr.msrb.gmra.mxu2 %v169_v5  ;;  %v176_v5 = vpack.c.bf16 %v168_v32, %v167_v3 }
  0x79   :  { %839 = vmatpush.bf16.msrb.mxu0 %v1149_v7 }
  0x7a   :  { %888 = vmatpush.bf16.msrb.mxu1 %v1149_v7 }
  0x7d   :  { %840 = vmatpush.bf16.msrb.mxu0 %v1148_v46 }
  0x7e   :  { %889 = vmatpush.bf16.msrb.mxu1 %v1148_v46 }
  0x87   :  { %464 = vmatmul.bf16.gmra.mxu2 %v170_v21 }
  0x97   :  { %469 = vmatmul.bf16.gmra.mxu2 %v171_v30 }
  0xa7   :  { %474 = vmatmul.bf16.gmra.mxu2 %v172_v37 }
  0xb4   :  { %v314_v8 = vpop.f32.mrf.mxu0 }
  0xb6   :  { %v411_v9 = vpop.f32.mrf.mxu1 }
  0xb7   :  { %479 = vmatmul.bf16.gmra.mxu2 %v173_v45  ;;  %v412_v16 = vadd.f32 %v411_v9, %v314_v8 }
  0xba   :  { %v1484_v50 = vpop.f32.mrf.mxu2 }
  0xbc   :  { %v316_v47 = vpop.f32.mrf.mxu0 }
  0xbe   :  { %v413_v11 = vpop.f32.mrf.mxu1 }
  0xbf   :  { %v414_v27 = vadd.f32 %v413_v11, %v316_v47 }
  0xc2   :  { %v1490_v55 = vpop.f32.mrf.mxu2 }
  0xc4   :  { %v319_v20 = vpop.f32.mrf.mxu0 }
  0xc6   :  { %v416_v21 = vpop.f32.mrf.mxu1 }
  0xc7   :  { %484 = vmatmul.bf16.gmra.mxu2 %v174_v56  ;;  %v417_v37 = vadd.f32 %v416_v21, %v319_v20 }
  0xca   :  { %v1492_v25 = vpop.f32.mrf.mxu2 }
  0xcc   :  { %v321_v35 = vpop.f32.mrf.mxu0 }
  0xce   :  { %v418_v36 = vpop.f32.mrf.mxu1 }
  0xcf   :  { %v419_v57 = vadd.f32 %v418_v36, %v321_v35 }
  0xd2   :  { %v1498_v62 = vpop.f32.mrf.mxu2 }
  0xd4   :  { %v324_v12 = vpop.f32.mrf.mxu0 }
  0xd6   :  { %v421_v56 = vpop.f32.mrf.mxu1 }
  0xd7   :  { %489 = vmatmul.bf16.gmra.mxu2 %v175_v63  ;;  %v422_v23 = vadd.f32 %v421_v56, %v324_v12 }
  0xda   :  { %v1500_v38 = vpop.f32.mrf.mxu2 }
  0xdc   :  { %v326_v0 = vpop.f32.mrf.mxu0 }
  0xde   :  { %v423_v39 = vpop.f32.mrf.mxu1 }
  0xdf   :  { %v424_v46 = vadd.f32 %v423_v39, %v326_v0 }
  0xe2   :  { %v1506_v33 = vpop.f32.mrf.mxu2 }
  0xe7   :  { %494 = vmatmul.bf16.gmra.mxu2 %v176_v5 }
  0xea   :  { %v1508_v52 = vpop.f32.mrf.mxu2 }
  0xf2   :  { %v1510_v10 = vpop.f32.mrf.mxu2 }
  0xfa   :  { %v460_v18 = vpop.f32.mrf.mxu2 }
  0xfb   :  { %v500_v19 = vadd.f32 %v460_v18, %v412_v16  ;;  %v329_v18 = vpop.f32.mrf.mxu0 }
  0xfd   :  { %v520_v22 = vadd.f32 %v1515_v17, %v500_v19  ;;  %v426_v19 = vpop.f32.mrf.mxu1 }
  0xff   :  { %v536_v28 = vmax.f32 %v520_v22, 0.0  ;;  %v427_v22 = vadd.f32 %v426_v19, %v329_v18 }
 0x101   :  { %v552_v31 = vpack.c.bf16 %v536_v28, %v536_v28 }
 0x102   :  { %v462_v29 = vpop.f32.mrf.mxu2 }
 0x103   :  { %v501_v30 = vadd.f32 %v462_v29, %v414_v27  ;;  %v568_v41 = vunpack.c.l.bf16 %v552_v31  ;;  %v656_v48 = vunpack.c.l.b16 %v552_v31 }
 0x105   :  { %v521_v34 = vadd.f32 %v1515_v17, %v501_v30  ;;  %v584_v51 = vsub.f32 %v536_v28, %v568_v41  ;;  %v431_v28 = vpop.f32.mrf.mxu3 }
 0x107   :  { %v537_v40 = vmax.f32 %v521_v34, 0.0 }
 0x109   :  { %v553_v42 = vpack.c.bf16 %v537_v40, %v537_v40 }
 0x10a   :  { %v465_v43 = vpop.f32.mrf.mxu2 }
 0x10b   :  { %v569_v44 = vunpack.c.l.bf16 %v553_v42  ;;  %v502_v45 = vadd.f32 %v465_v43, %v417_v37  ;;  %v657_v49 = vunpack.c.l.b16 %v553_v42 }
 0x10d   :  { %v585_v14 = vsub.f32 %v537_v40, %v569_v44  ;;  %v522_v15 = vadd.f32 %v1515_v17, %v502_v45  ;;  %v672_v54 = vpack.c.b16 %v657_v49, %v656_v48  ;;  %v331_v44 = vpop.f32.mrf.mxu0  ;;  %v428_v45 = vpop.f32.mrf.mxu1 }
 0x10e   :  { %v429_v49 = vadd.f32 %v428_v45, %v331_v44 }
 0x10f   :  { %744 = vmatmul.bf16.vlgmr.msrb.gmra.mxu3 %v672_v54  ;;  %841 = vmatmul.bf16.vlgmr.msrb.gmra.mxu0 %v672_v54  ;;  %v600_v13 = vpack.c.bf16 %v585_v14, %v584_v51  ;;  %v538_v58 = vmax.f32 %v522_v15, 0.0  ;;  %v433_v14 = vpop.f32.mrf.mxu3 }
 0x111   :  { %890 = vmatmul.bf16.vlgmr.msrb.gmra.mxu1 %v600_v13  ;;  %v554_v60 = vpack.c.bf16 %v538_v58, %v538_v58 }
 0x112   :  { %v467_v26 = vpop.f32.mrf.mxu2 }
 0x113   :  { %v503_v59 = vadd.f32 %v467_v26, %v419_v57  ;;  %v570_v1 = vunpack.c.l.bf16 %v554_v60  ;;  %v658_v32 = vunpack.c.l.b16 %v554_v60  ;;  %v432_v57 = vadd.f32 %v431_v28, %v1484_v50 }
 0x115   :  { %v523_v61 = vadd.f32 %v1515_v17, %v503_v59  ;;  %v586_v8 = vsub.f32 %v538_v58, %v570_v1 }
 0x117   :  { %v539_v24 = vmax.f32 %v523_v61, 0.0 }
 0x119   :  { %v555_v63 = vpack.c.bf16 %v539_v24, %v539_v24 }
 0x11a   :  { %v470_v2 = vpop.f32.mrf.mxu2 }
 0x11b   :  { %v504_v3 = vadd.f32 %v470_v2, %v422_v23  ;;  %v659_v4 = vunpack.c.l.b16 %v555_v63  ;;  %v571_v5 = vunpack.c.l.bf16 %v555_v63  ;;  %v436_v63 = vpop.f32.mrf.mxu3 }
 0x11d   :  { %v524_v6 = vadd.f32 %v1515_v17, %v504_v3  ;;  %v673_v7 = vpack.c.b16 %v659_v4, %v658_v32  ;;  %v587_v9 = vsub.f32 %v539_v24, %v571_v5  ;;  %v434_v32 = vadd.f32 %v433_v14, %v1490_v55 }
 0x11f   :  { %749 = vmatmul.bf16.gmra.mxu3 %v673_v7  ;;  %846 = vmatmul.bf16.gmra.mxu0 %v673_v7  ;;  %v601_v53 = vpack.c.bf16 %v587_v9, %v586_v8  ;;  %v540_v47 = vmax.f32 %v524_v6, 0.0 }
 0x121   :  { %895 = vmatmul.bf16.gmra.mxu1 %v601_v53  ;;  %v556_v20 = vpack.c.bf16 %v540_v47, %v540_v47  ;;  %v437_v53 = vadd.f32 %v436_v63, %v1492_v25 }
 0x122   :  { %v472_v11 = vpop.f32.mrf.mxu2 }
 0x123   :  { %v505_v16 = vadd.f32 %v472_v11, %v424_v46  ;;  %v572_v30 = vunpack.c.l.bf16 %v556_v20  ;;  %v660_v35 = vunpack.c.l.b16 %v556_v20  ;;  %v438_v8 = vpop.f32.mrf.mxu3 }
 0x125   :  { %v525_v21 = vadd.f32 %v1515_v17, %v505_v16  ;;  %v588_v42 = vsub.f32 %v540_v47, %v572_v30  ;;  %v439_v30 = vadd.f32 %v438_v8, %v1498_v62 }
 0x127   :  { %v541_v27 = vmax.f32 %v525_v21, 0.0 }
 0x129   :  { %v557_v29 = vpack.c.bf16 %v541_v27, %v541_v27 }
 0x12a   :  { %v475_v31 = vpop.f32.mrf.mxu2 }
 0x12b   :  { %v506_v34 = vadd.f32 %v475_v31, %v427_v22  ;;  %v661_v36 = vunpack.c.l.b16 %v557_v29  ;;  %v573_v37 = vunpack.c.l.bf16 %v557_v29  ;;  %v441_v29 = vpop.f32.mrf.mxu3 }
 0x12d   :  { %v526_v40 = vadd.f32 %v1515_v17, %v506_v34  ;;  %v674_v41 = vpack.c.b16 %v661_v36, %v660_v35  ;;  %v589_v43 = vsub.f32 %v541_v27, %v573_v37 }
 0x12f   :  { %754 = vmatmul.bf16.gmra.mxu3 %v674_v41  ;;  %851 = vmatmul.bf16.gmra.mxu0 %v674_v41  ;;  %v602_v48 = vpack.c.bf16 %v589_v43, %v588_v42  ;;  %v542_v51 = vmax.f32 %v526_v40, 0.0  ;;  %v442_v40 = vadd.f32 %v441_v29, %v1500_v38 }
 0x131   :  { %900 = vmatmul.bf16.gmra.mxu1 %v602_v48  ;;  %v558_v12 = vpack.c.bf16 %v542_v51, %v542_v51 }
 0x132   :  { %v477_v15 = vpop.f32.mrf.mxu2 }
 0x133   :  { %v507_v54 = vadd.f32 %v477_v15, %v429_v49  ;;  %v574_v26 = vunpack.c.l.bf16 %v558_v12  ;;  %v662_v61 = vunpack.c.l.b16 %v558_v12  ;;  %v443_v43 = vpop.f32.mrf.mxu3 }
 0x135   :  { %v527_v13 = vadd.f32 %v1515_v17, %v507_v54  ;;  %v590_v39 = vsub.f32 %v542_v51, %v574_v26 }
 0x137   :  { %v543_v56 = vmax.f32 %v527_v13, 0.0  ;;  %v444_v13 = vadd.f32 %v443_v43, %v1506_v33 }
 0x139   :  { %v559_v58 = vpack.c.bf16 %v543_v56, %v543_v56 }
 0x13a   :  { %v480_v59 = vpop.f32.mrf.mxu2 }
 0x13b   :  { %v508_v60 = vadd.f32 %v480_v59, %v432_v57  ;;  %v663_v23 = vunpack.c.l.b16 %v559_v58  ;;  %v575_v24 = vunpack.c.l.bf16 %v559_v58  ;;  %v446_v58 = vpop.f32.mrf.mxu3 }
 0x13d   :  { %v528_v0 = vadd.f32 %v1515_v17, %v508_v60  ;;  %v675_v1 = vpack.c.b16 %v663_v23, %v662_v61  ;;  %v591_v2 = vsub.f32 %v543_v56, %v575_v24  ;;  %v447_v61 = vadd.f32 %v446_v58, %v1508_v52 }
 0x13f   :  { %759 = vmatmul.bf16.gmra.mxu3 %v675_v1  ;;  %856 = vmatmul.bf16.gmra.mxu0 %v675_v1  ;;  %v603_v3 = vpack.c.bf16 %v591_v2, %v590_v39  ;;  %v544_v4 = vmax.f32 %v528_v0, 0.0 }
 0x141   :  { %905 = vmatmul.bf16.gmra.mxu1 %v603_v3  ;;  %v560_v6 = vpack.c.bf16 %v544_v4, %v544_v4 }
 0x142   :  { %v482_v50 = vpop.f32.mrf.mxu2 }
 0x143   :  { %v509_v5 = vadd.f32 %v482_v50, %v434_v32  ;;  %v576_v47 = vunpack.c.l.bf16 %v560_v6  ;;  %v664_v18 = vunpack.c.l.b16 %v560_v6  ;;  %v448_v50 = vpop.f32.mrf.mxu3 }
 0x144   :  { %v449_v6 = vadd.f32 %v448_v50, %v1510_v10 }
 0x145   :  { %v529_v7 = vadd.f32 %v1515_v17, %v509_v5  ;;  %v592_v22 = vsub.f32 %v544_v4, %v576_v47 }
 0x147   :  { %v545_v9 = vmax.f32 %v529_v7, 0.0 }
 0x149   :  { %v561_v46 = vpack.c.bf16 %v545_v9, %v545_v9 }
 0x14a   :  { %v485_v11 = vpop.f32.mrf.mxu2 }
 0x14b   :  { %v510_v16 = vadd.f32 %v485_v11, %v437_v53  ;;  %v665_v19 = vunpack.c.l.b16 %v561_v46  ;;  %v577_v20 = vunpack.c.l.bf16 %v561_v46 }
 0x14d   :  { %v530_v55 = vadd.f32 %v1515_v17, %v510_v16  ;;  %v676_v21 = vpack.c.b16 %v665_v19, %v664_v18  ;;  %v593_v27 = vsub.f32 %v545_v9, %v577_v20 }
 0x14f   :  { %764 = vmatmul.bf16.gmra.mxu3 %v676_v21  ;;  %861 = vmatmul.bf16.gmra.mxu0 %v676_v21  ;;  %v604_v28 = vpack.c.bf16 %v593_v27, %v592_v22  ;;  %v546_v31 = vmax.f32 %v530_v55, 0.0 }
 0x151   :  { %910 = vmatmul.bf16.gmra.mxu1 %v604_v28  ;;  %v562_v35 = vpack.c.bf16 %v546_v31, %v546_v31 }
 0x152   :  { %v487_v25 = vpop.f32.mrf.mxu2 }
 0x153   :  { %v511_v34 = vadd.f32 %v487_v25, %v439_v30  ;;  %v578_v42 = vunpack.c.l.bf16 %v562_v35  ;;  %v666_v48 = vunpack.c.l.b16 %v562_v35 }
 0x155   :  { %v531_v36 = vadd.f32 %v1515_v17, %v511_v34  ;;  %v594_v15 = vsub.f32 %v546_v31, %v578_v42 }
 0x157   :  { %v547_v37 = vmax.f32 %v531_v36, 0.0 }
 0x159   :  { %v563_v41 = vpack.c.bf16 %v547_v37, %v547_v37 }
 0x15a   :  { %v490_v44 = vpop.f32.mrf.mxu2 }
 0x15b   :  { %v512_v45 = vadd.f32 %v490_v44, %v442_v40  ;;  %v667_v49 = vunpack.c.l.b16 %v563_v41  ;;  %v579_v51 = vunpack.c.l.bf16 %v563_v41 }
 0x15d   :  { %v532_v62 = vadd.f32 %v1515_v17, %v512_v45  ;;  %v677_v14 = vpack.c.b16 %v667_v49, %v666_v48  ;;  %v595_v54 = vsub.f32 %v547_v37, %v579_v51 }
 0x15f   :  { %769 = vmatmul.bf16.gmra.mxu3 %v677_v14  ;;  %866 = vmatmul.bf16.gmra.mxu0 %v677_v14  ;;  %v605_v12 = vpack.c.bf16 %v595_v54, %v594_v15  ;;  %v548_v56 = vmax.f32 %v532_v62, 0.0 }
 0x161   :  { %915 = vmatmul.bf16.gmra.mxu1 %v605_v12  ;;  %v564_v26 = vpack.c.bf16 %v548_v56, %v548_v56 }
 0x162   :  { %v492_v38 = vpop.f32.mrf.mxu2 }
 0x163   :  { %v513_v57 = vadd.f32 %v492_v38, %v444_v13  ;;  %v580_v24 = vunpack.c.l.bf16 %v564_v26  ;;  %v668_v1 = vunpack.c.l.b16 %v564_v26 }
 0x165   :  { %v533_v59 = vadd.f32 %v1515_v17, %v513_v57  ;;  %v596_v32 = vsub.f32 %v548_v56, %v580_v24 }
 0x167   :  { %v549_v60 = vmax.f32 %v533_v59, 0.0 }
 0x169   :  { %v565_v23 = vpack.c.bf16 %v549_v60, %v549_v60 }
 0x16a   :  { %v495_v63 = vpop.f32.mrf.mxu2 }
 0x16b   :  { %v514_v0 = vadd.f32 %v495_v63, %v447_v61  ;;  %v669_v39 = vunpack.c.l.b16 %v565_v23  ;;  %v581_v2 = vunpack.c.l.bf16 %v565_v23 }
 0x16d   :  { %v534_v33 = vadd.f32 %v1515_v17, %v514_v0  ;;  %v678_v3 = vpack.c.b16 %v669_v39, %v668_v1  ;;  %v597_v4 = vsub.f32 %v549_v60, %v581_v2 }
 0x16f   :  { %774 = vmatmul.bf16.gmra.mxu3 %v678_v3  ;;  %871 = vmatmul.bf16.gmra.mxu0 %v678_v3  ;;  %v606_v5 = vpack.c.bf16 %v597_v4, %v596_v32  ;;  %v550_v7 = vmax.f32 %v534_v33, 0.0 }
 0x171   :  { %920 = vmatmul.bf16.gmra.mxu1 %v606_v5  ;;  %v566_v9 = vpack.c.bf16 %v550_v7, %v550_v7 }
 0x172   :  { %v497_v52 = vpop.f32.mrf.mxu2 }
 0x173   :  { %v515_v8 = vadd.f32 %v497_v52, %v449_v6  ;;  %v582_v11 = vunpack.c.l.bf16 %v566_v9  ;;  %v670_v16 = vunpack.c.l.b16 %v566_v9 }
 0x175   :  { %v535_v53 = vadd.f32 %v1515_v17, %v515_v8  ;;  %v598_v55 = vsub.f32 %v550_v7, %v582_v11  ;;  %v1544_v17 = vld [vmem:[%s1574_s6] ss:$0 sm:$0xff]  ;;  %s1353_s6 = smov [#allocation11]  }
 0x176   :  { %s987_s28 = sshll.u32 %s1353_s6, 4  ;;  %s988_s28 = int_to_ptr.vmem [resolvable:$true] %s987_s28 }
 0x177   :  { %v551_v46 = vmax.f32 %v535_v53, 0.0 }
 0x179   :  { %v567_v47 = vpack.c.bf16 %v551_v46, %v551_v46 }
 0x17b   :  { %v671_v18 = vunpack.c.l.b16 %v567_v47  ;;  %v583_v19 = vunpack.c.l.bf16 %v567_v47 }
 0x17d   :  { %v679_v20 = vpack.c.b16 %v671_v18, %v670_v16  ;;  %v599_v21 = vsub.f32 %v551_v46, %v583_v19 }
 0x17f   :  { %779 = vmatmul.bf16.gmra.mxu3 %v679_v20  ;;  %876 = vmatmul.bf16.gmra.mxu0 %v679_v20  ;;  %v607_v22 = vpack.c.bf16 %v599_v21, %v598_v55 }
 0x181   :  { %925 = vmatmul.bf16.gmra.mxu1 %v607_v22 }
 0x18c   :  { %v842_v10 = vpop.f32.mrf.mxu0 }
 0x18e   :  { %v891_v27 = vpop.f32.mrf.mxu1 }
 0x192   :  { %v745_v28 = vpop.f32.mrf.mxu3 }
 0x193   :  { %v843_v29 = vadd.f32 %v842_v10, %v745_v28 }
 0x194   :  { %v844_v30 = vpop.f32.mrf.mxu0 }
 0x195   :  { %v931_v31 = vadd.f32 %v891_v27, %v843_v29 }
 0x196   :  { %v893_v25 = vpop.f32.mrf.mxu1 }
 0x197   :  { %v951_v34 = vadd.f32 %v1544_v17, %v931_v31 }
 0x199   :  { %967 = vst [vmem:[#allocation11] sm:$0xff] %v951_v34 }
 0x19a   :  { %v747_v35 = vpop.f32.mrf.mxu3 }
 0x19b   :  { %v845_v36 = vadd.f32 %v844_v30, %v747_v35 }
 0x19c   :  { %v847_v37 = vpop.f32.mrf.mxu0 }
 0x19d   :  { %v932_v40 = vadd.f32 %v893_v25, %v845_v36 }
 0x19e   :  { %v896_v41 = vpop.f32.mrf.mxu1 }
 0x19f   :  { %v952_v42 = vadd.f32 %v1544_v17, %v932_v40 }
 0x1a1   :  { %968 = vst [vmem:[#allocation11 + $0x8] sm:$0xff] %v952_v42 }
 0x1a2   :  { %v750_v43 = vpop.f32.mrf.mxu3 }
 0x1a3   :  { %v848_v44 = vadd.f32 %v847_v37, %v750_v43 }
 0x1a4   :  { %v849_v45 = vpop.f32.mrf.mxu0 }
 0x1a5   :  { %v933_v48 = vadd.f32 %v896_v41, %v848_v44 }
 0x1a6   :  { %v898_v49 = vpop.f32.mrf.mxu1 }
 0x1a7   :  { %v953_v51 = vadd.f32 %v1544_v17, %v933_v48 }
 0x1a9   :  { %969 = vst [vmem:[#allocation11 + $0x10] sm:$0xff] %v953_v51 }
 0x1aa   :  { %v752_v62 = vpop.f32.mrf.mxu3 }
 0x1ab   :  { %v850_v14 = vadd.f32 %v849_v45, %v752_v62 }
 0x1ac   :  { %v852_v15 = vpop.f32.mrf.mxu0 }
 0x1ad   :  { %v934_v54 = vadd.f32 %v898_v49, %v850_v14 }
 0x1ae   :  { %v901_v12 = vpop.f32.mrf.mxu1 }
 0x1af   :  { %v954_v13 = vadd.f32 %v1544_v17, %v934_v54 }
 0x1b1   :  { %970 = vst [vmem:[#allocation11 + $0x18] sm:$0xff] %v954_v13 }
 0x1b2   :  { %v755_v56 = vpop.f32.mrf.mxu3 }
 0x1b3   :  { %v853_v38 = vadd.f32 %v852_v15, %v755_v56 }
 0x1b4   :  { %v854_v57 = vpop.f32.mrf.mxu0 }
 0x1b5   :  { %v935_v58 = vadd.f32 %v901_v12, %v853_v38 }
 0x1b6   :  { %v903_v26 = vpop.f32.mrf.mxu1 }
 0x1b7   :  { %v955_v59 = vadd.f32 %v1544_v17, %v935_v58 }
 0x1b9   :  { %971 = vst [vmem:[#allocation11 + $0x20] sm:$0xff] %v955_v59 }
 0x1ba   :  { %v757_v60 = vpop.f32.mrf.mxu3 }
 0x1bb   :  { %v855_v61 = vadd.f32 %v854_v57, %v757_v60 }
 0x1bc   :  { %v857_v23 = vpop.f32.mrf.mxu0 }
 0x1bd   :  { %v936_v24 = vadd.f32 %v903_v26, %v855_v61 }
 0x1be   :  { %v906_v63 = vpop.f32.mrf.mxu1 }
 0x1bf   :  { %v956_v0 = vadd.f32 %v1544_v17, %v936_v24 }
 0x1c1   :  { %972 = vst [vmem:[#allocation11 + $0x28] sm:$0xff] %v956_v0 }
 0x1c2   :  { %v760_v1 = vpop.f32.mrf.mxu3 }
 0x1c3   :  { %v858_v39 = vadd.f32 %v857_v23, %v760_v1 }
 0x1c4   :  { %v859_v2 = vpop.f32.mrf.mxu0 }
 0x1c5   :  { %v937_v33 = vadd.f32 %v906_v63, %v858_v39 }
 0x1c6   :  { %v908_v3 = vpop.f32.mrf.mxu1 }
 0x1c7   :  { %v957_v32 = vadd.f32 %v1544_v17, %v937_v33 }
 0x1c9   :  { %973 = vst [vmem:[#allocation11 + $0x30] sm:$0xff] %v957_v32 }
 0x1ca   :  { %v762_v4 = vpop.f32.mrf.mxu3 }
 0x1cb   :  { %v860_v50 = vadd.f32 %v859_v2, %v762_v4 }
 0x1cc   :  { %v862_v5 = vpop.f32.mrf.mxu0 }
 0x1cd   :  { %v938_v6 = vadd.f32 %v908_v3, %v860_v50 }
 0x1ce   :  { %v911_v7 = vpop.f32.mrf.mxu1 }
 0x1cf   :  { %v958_v52 = vadd.f32 %v1544_v17, %v938_v6 }
 0x1d1   :  { %974 = vst [vmem:[#allocation11 + $0x38] sm:$0xff] %v958_v52 }
 0x1d2   :  { %v765_v8 = vpop.f32.mrf.mxu3 }
 0x1d3   :  { %v863_v9 = vadd.f32 %v862_v5, %v765_v8 }
 0x1d4   :  { %v864_v53 = vpop.f32.mrf.mxu0 }
 0x1d5   :  { %v939_v46 = vadd.f32 %v911_v7, %v863_v9 }
 0x1d6   :  { %v913_v47 = vpop.f32.mrf.mxu1 }
 0x1d7   :  { %v959_v11 = vadd.f32 %v1544_v17, %v939_v46 }
 0x1d9   :  { %975 = vst [vmem:[#allocation11 + $0x40] sm:$0xff] %v959_v11 }
 0x1da   :  { %v767_v16 = vpop.f32.mrf.mxu3 }
 0x1db   :  { %v865_v18 = vadd.f32 %v864_v53, %v767_v16 }
 0x1dc   :  { %v867_v19 = vpop.f32.mrf.mxu0 }
 0x1dd   :  { %v940_v20 = vadd.f32 %v913_v47, %v865_v18 }
 0x1de   :  { %v916_v55 = vpop.f32.mrf.mxu1 }
 0x1df   :  { %v960_v21 = vadd.f32 %v1544_v17, %v940_v20 }
 0x1e1   :  { %976 = vst [vmem:[#allocation11 + $0x48] sm:$0xff] %v960_v21 }
 0x1e2   :  { %v770_v22 = vpop.f32.mrf.mxu3 }
 0x1e3   :  { %v868_v10 = vadd.f32 %v867_v19, %v770_v22 }
 0x1e4   :  { %v869_v27 = vpop.f32.mrf.mxu0 }
 0x1e5   :  { %v941_v28 = vadd.f32 %v916_v55, %v868_v10 }
 0x1e6   :  { %v918_v29 = vpop.f32.mrf.mxu1 }
 0x1e7   :  { %v961_v30 = vadd.f32 %v1544_v17, %v941_v28 }
 0x1e9   :  { %977 = vst [vmem:[#allocation11 + $0x50] sm:$0xff] %v961_v30 }
 0x1ea   :  { %v772_v31 = vpop.f32.mrf.mxu3 }
 0x1eb   :  { %v870_v25 = vadd.f32 %v869_v27, %v772_v31 }
 0x1ec   :  { %v872_v34 = vpop.f32.mrf.mxu0 }
 0x1ed   :  { %v942_v35 = vadd.f32 %v918_v29, %v870_v25 }
 0x1ee   :  { %v921_v36 = vpop.f32.mrf.mxu1 }
 0x1ef   :  { %v962_v37 = vadd.f32 %v1544_v17, %v942_v35 }
 0x1f1   :  { %978 = vst [vmem:[#allocation11 + $0x58] sm:$0xff] %v962_v37 }
 0x1f2   :  { %v775_v40 = vpop.f32.mrf.mxu3 }
 0x1f3   :  { %v873_v41 = vadd.f32 %v872_v34, %v775_v40 }
 0x1f4   :  { %v874_v43 = vpop.f32.mrf.mxu0 }
 0x1f5   :  { %v943_v42 = vadd.f32 %v921_v36, %v873_v41 }
 0x1f6   :  { %v923_v45 = vpop.f32.mrf.mxu1 }
 0x1f7   :  { %v963_v44 = vadd.f32 %v1544_v17, %v943_v42 }
 0x1f9   :  { %979 = vst [vmem:[#allocation11 + $0x60] sm:$0xff] %v963_v44 }
 0x1fa   :  { %v777_v48 = vpop.f32.mrf.mxu3 }
 0x1fb   :  { %v875_v49 = vadd.f32 %v874_v43, %v777_v48 }
 0x1fc   :  { %v877_v14 = vpop.f32.mrf.mxu0 }
 0x1fd   :  { %v944_v51 = vadd.f32 %v923_v45, %v875_v49 }
 0x1fe   :  { %v926_v15 = vpop.f32.mrf.mxu1 }
 0x1ff   :  { %v964_v62 = vadd.f32 %v1544_v17, %v944_v51 }
 0x201   :  { %980 = vst [vmem:[#allocation11 + $0x68] sm:$0xff] %v964_v62 }
 0x202   :  { %v780_v54 = vpop.f32.mrf.mxu3 }
 0x203   :  { %v878_v12 = vadd.f32 %v877_v14, %v780_v54 }
 0x204   :  { %v879_v38 = vpop.f32.mrf.mxu0 }
 0x205   :  { %v945_v13 = vadd.f32 %v926_v15, %v878_v12 }
 0x206   :  { %v928_v26 = vpop.f32.mrf.mxu1 }
 0x207   :  { %v965_v56 = vadd.f32 %v1544_v17, %v945_v13 }
 0x209   :  { %981 = vst [vmem:[#allocation11 + $0x70] sm:$0xff] %v965_v56 }
 0x20a   :  { %v782_v57 = vpop.f32.mrf.mxu3 }
 0x20b   :  { %v880_v58 = vadd.f32 %v879_v38, %v782_v57 }
 0x20d   :  { %v946_v59 = vadd.f32 %v928_v26, %v880_v58 }
 0x20f   :  { %v966_v60 = vadd.f32 %v1544_v17, %v946_v59 }
 0x211   :  { %982 = vst [vmem:[#allocation11 + $0x78] sm:$0xff] %v966_v60 }
 0x212   :  { %995 = dma.vmem_to_hbm [thread:$0]  %s988_s28, 2048, %s990_s8, [#allocation4], %s1349_s19, %s1349_s19, %s1350_s20  }
 0x213   :  { %1342 = dma.done.wait [#allocation4], 2048  }
 0x214   :  { %1343 = vsyncadd [#allocation4], 4294965248 }
 0x215   :  { %1000 = vsyncpa [#allocation3], 1 }
 0x216   :  { %1001 = vsyncpa [#allocation6], 1 }
 0x217   :  { %1002 = vsyncpa [#allocation9], 1 }
 0x218   :  { %1003 = vsyncpa [#allocation4], 1 }

</bundles_post_ra>
